<compile_context>
chip_gen: v6e
topology: v6e:2x2x1
jax: 0.10.0
libtpu: 0.0.40
codegen_flags: <defaults>
</compile_context>

<pallas_src>
import functools

import jax
import jax.numpy as jnp
from jax.experimental import pallas as pl
from jax.experimental.pallas import tpu as pltpu


def _round_up(x, m):
    return (x + m - 1) // m * m


# ---------------------------------------------------------------------------
# Pass 1: conv as two tap matmuls on the space-to-depth'd input + BN batch stats
# ---------------------------------------------------------------------------
def conv_stats_kernel(x_ref, w_ref, y_ref, stats_ref, *, ow, m):
    # x_ref:     (1, (OH+1)*OW, K2) bf16  s2d + kw-packed rows for one image
    # w_ref:     (2, K2, OCP)       bf16  per-kh-pair weight matrices
    # y_ref:     (1, M, OCP)        f32   conv output rows (M = OH*OW)
    # stats_ref: (1, 2, OCP)        f32   row 0 = sum(y), row 1 = sum(y*y)
    xv = x_ref[0]                                   # ((OH+1)*OW, K2) bf16

    # kh shift of the original 4x4/stride-2 conv == row shift of the flattened
    # s2d input: tap dh uses rows [dh*OW, dh*OW + M). Accumulate in f32.
    acc = jnp.dot(xv[0:m, :], w_ref[0],
                  preferred_element_type=jnp.float32)
    acc = acc + jnp.dot(xv[ow:ow + m, :], w_ref[1],
                        preferred_element_type=jnp.float32)

    y_ref[0] = acc

    # Per-image partial statistics (reduced over the batch in JAX glue), written
    # as two separate rows -> no concat, no resident accumulator.
    stats_ref[0, 0:1, :] = jnp.sum(acc, axis=0, keepdims=True)
    stats_ref[0, 1:2, :] = jnp.sum(acc * acc, axis=0, keepdims=True)


# ---------------------------------------------------------------------------
# Pass 2: fused BatchNorm affine + LeakyReLU (elementwise, f32 math, aliased)
# ---------------------------------------------------------------------------
def bn_lrelu_kernel(y_ref, scale_ref, shift_ref, o_ref, *, alpha):
    z = y_ref[...] * scale_ref[...] + shift_ref[...]
    o_ref[...] = jnp.where(z >= 0, z, alpha * z)


# ---------------------------------------------------------------------------
# Wrapper: full D_block forward (NCHW in / NCHW out, PyTorch convention)
# ---------------------------------------------------------------------------
def d_block_forward(x_nchw, weight_oihw, gamma, beta, *,
                    kernel_size=4, stride=2, padding=1, alpha=0.2, eps=1e-5):
    assert kernel_size == 4 and stride == 2 and padding == 1, \
        "space-to-depth decomposition specialised to k=4, s=2, p=1"
    n, ic, h, w = x_nchw.shape
    assert h % 2 == 0 and w % 2 == 0
    oc = weight_oihw.shape[0]
    oh, ow = h // 2, w // 2
    hp2, wp2 = oh + 1, ow + 1            # s2d spatial dims of the padded input
    c4 = 4 * ic
    k2 = 8 * ic                          # contraction dim of each tap matmul
    m = oh * ow
    ocp = _round_up(oc, 128)             # lane-dense output channels

    # ---- XLA glue: pad -> NHWC -> space-to-depth(2) -> kw-phase pack ----
    xf32 = x_nchw.astype(jnp.float32)
    xp = jnp.pad(xf32, ((0, 0), (0, 0), (1, 1), (1, 1))).transpose(0, 2, 3, 1)
    xs = xp.reshape(n, hp2, 2, wp2, 2, ic).transpose(0, 1, 3, 2, 4, 5)
    xs = xs.reshape(n, hp2, wp2, c4)                       # chan order (ph,pw,c)
    # pack the two kw phases of adjacent s2d columns, then flatten rows so each
    # conv tap is a contiguous, aligned row slab inside the kernel.
    xw = jnp.concatenate([xs[:, :, 0:ow, :], xs[:, :, 1:ow + 1, :]], axis=-1)
    xw = xw.reshape(n, hp2 * ow, k2).astype(jnp.bfloat16)

    # Weight (OC, IC, 4, 4) -> (2, 8*IC, OCP); kh=2*dh+ph, kw=2*dw+pw,
    # K order (dw, ph, pw, c) to match the packed input channels.
    wt = weight_oihw.astype(jnp.float32).reshape(oc, ic, 2, 2, 2, 2)
    wt = wt.transpose(2, 4, 3, 5, 1, 0).reshape(2, k2, oc)
    wt = jnp.pad(wt, ((0, 0), (0, 0), (0, ocp - oc))).astype(jnp.bfloat16)

    # ---- Pass 1: conv (bf16 MXU, f32 accum) + per-image BN statistics ----
    y, stats = pl.pallas_call(
        functools.partial(conv_stats_kernel, ow=ow, m=m),
        out_shape=(
            jax.ShapeDtypeStruct((n, m, ocp), jnp.float32),
            jax.ShapeDtypeStruct((n, 2, ocp), jnp.float32),
        ),
        grid_spec=pltpu.PrefetchScalarGridSpec(
            num_scalar_prefetch=0,
            grid=(n,),
            in_specs=[
                pl.BlockSpec((1, hp2 * ow, k2), lambda i: (i, 0, 0)),
                pl.BlockSpec((2, k2, ocp), lambda i: (0, 0, 0)),
            ],
            out_specs=[
                pl.BlockSpec((1, m, ocp), lambda i: (i, 0, 0)),
                pl.BlockSpec((1, 2, ocp), lambda i: (i, 0, 0)),
            ],
        ),
        compiler_params=pltpu.CompilerParams(
            dimension_semantics=("parallel",)),
    )(xw, wt)

    # Tiny per-channel glue: reduce per-image stats, fold BN into scale/shift.
    # (Training-mode BatchNorm2d: biased batch variance.)
    count = jnp.float32(n * m)
    ssum = jnp.sum(stats[:, 0, :], axis=0)
    ssq = jnp.sum(stats[:, 1, :], axis=0)
    meanc = ssum / count
    varc = ssq / count - meanc * meanc
    inv_std = jax.lax.rsqrt(varc + eps)
    gp = jnp.pad(gamma.astype(jnp.float32), (0, ocp - oc), constant_values=1.0)
    bp = jnp.pad(beta.astype(jnp.float32), (0, ocp - oc))
    scale = (gp * inv_std)[None, :]                       # (1, OCP)
    shift = (bp - meanc * gp * inv_std)[None, :]          # (1, OCP)

    # ---- Pass 2: fused BN affine + LeakyReLU, written in place over y ----
    out_p = pl.pallas_call(
        functools.partial(bn_lrelu_kernel, alpha=alpha),
        out_shape=jax.ShapeDtypeStruct((n, m, ocp), jnp.float32),
        grid_spec=pltpu.PrefetchScalarGridSpec(
            num_scalar_prefetch=0,
            grid=(n,),
            in_specs=[
                pl.BlockSpec((1, m, ocp), lambda i: (i, 0, 0)),
                pl.BlockSpec((1, ocp), lambda i: (0, 0)),
                pl.BlockSpec((1, ocp), lambda i: (0, 0)),
            ],
            out_specs=pl.BlockSpec((1, m, ocp), lambda i: (i, 0, 0)),
        ),
        input_output_aliases={0: 0},
        compiler_params=pltpu.CompilerParams(
            dimension_semantics=("parallel",)),
    )(y, scale, shift)

    # Slice off channel padding; NHWC -> NCHW only to match the PyTorch API.
    out = out_p[:, :, :oc].reshape(n, oh, ow, oc).transpose(0, 3, 1, 2)
    return out


# ---------------------------------------------------------------------------
# Pure-JAX reference (correctness checking only)
# ---------------------------------------------------------------------------
def d_block_reference(x, weight, gamma, beta, *, stride=2, padding=1,
                      alpha=0.2, eps=1e-5):
    y = jax.lax.conv_general_dilated(
        x.astype(jnp.float32), weight.astype(jnp.float32),
        window_strides=(stride, stride),
        padding=[(padding, padding), (padding, padding)],
        dimension_numbers=("NCHW", "OIHW", "NCHW"))
    mean = y.mean(axis=(0, 2, 3), keepdims=True)
    var = ((y - mean) ** 2).mean(axis=(0, 2, 3), keepdims=True)
    yhat = (y - mean) * jax.lax.rsqrt(var + eps)
    z = gamma[None, :, None, None] * yhat + beta[None, :, None, None]
    return jnp.where(z >= 0, z, alpha * z)


if __name__ == "__main__":
    key = jax.random.PRNGKey(0)
    k_x, k_w = jax.random.split(key)

    N, IC, H, W = 2, 4, 16, 16
    OC, K = 8, 4

    # Round test inputs to bf16-representable values: the kernel feeds the MXU
    # in bf16 (with f32 accumulation), so this keeps the f32 reference
    # comparison tight without changing kernel semantics.
    x = jax.random.normal(k_x, (N, IC, H, W), dtype=jnp.float32)
    x = x.astype(jnp.bfloat16).astype(jnp.float32)
    weight = jax.random.normal(k_w, (OC, IC, K, K), dtype=jnp.float32) * 0.1
    weight = weight.astype(jnp.bfloat16).astype(jnp.float32)
    gamma = 1.0 + 0.05 * jnp.arange(OC, dtype=jnp.float32)
    beta = 0.01 * jnp.arange(OC, dtype=jnp.float32)

    fwd = jax.jit(functools.partial(d_block_forward, kernel_size=K, stride=2,
                                    padding=1, alpha=0.2))
    out = jax.block_until_ready(fwd(x, weight, gamma, beta))

    ref = d_block_reference(x, weight, gamma, beta, stride=2, padding=1,
                            alpha=0.2)
    assert out.shape == (N, OC, H // 2, W // 2), out.shape
    max_err = float(jnp.max(jnp.abs(out - ref)))
    assert jnp.allclose(out, ref, atol=2e-3, rtol=2e-3), max_err

    print("KERNEL_OK")
</pallas_src>

<mosaic_0001>
module attributes {stable_mosaic.version = 11 : i64} {
  func.func @conv_stats_kernel(%arg0: i32, %arg1: memref<1x72x32xbf16, #tpu.memory_space<vmem>>, %arg2: memref<2x32x128xbf16, #tpu.memory_space<vmem>>, %arg3: memref<1x64x128xf32, #tpu.memory_space<vmem>>, %arg4: memref<1x2x128xf32, #tpu.memory_space<vmem>>) attributes {dimension_semantics = [#tpu.dimension_semantics<parallel>], iteration_bounds = array<i64: 2>, scalar_prefetch = 0 : i64, scratch_operands = 0 : i64, tpu.core_type = #tpu.core_type<tc>, window_params = [{transform_indices = @transform_0, window_bounds = array<i64: 1, 72, 32>}, {pipeline_mode = #tpu.pipeline_mode<synchronous>, transform_indices = @transform_1, window_bounds = array<i64: 2, 32, 128>}, {transform_indices = @transform_2, window_bounds = array<i64: 1, 64, 128>}, {transform_indices = @transform_3, window_bounds = array<i64: 1, 2, 128>}]} {
    %c0 = arith.constant 0 : index
    %c0_0 = arith.constant 0 : index
    %c0_1 = arith.constant 0 : index
    %0 = vector.load %arg1[%c0, %c0_0, %c0_1] : memref<1x72x32xbf16, #tpu.memory_space<vmem>>, vector<1x72x32xbf16>
    %1 = vector.shape_cast %0 : vector<1x72x32xbf16> to vector<72x32xbf16>
    %2 = vector.extract_strided_slice %1 {offsets = [0, 0], sizes = [64, 32], strides = [1, 1]} : vector<72x32xbf16> to vector<64x32xbf16>
    %c0_2 = arith.constant 0 : index
    %c0_3 = arith.constant 0 : index
    %c0_4 = arith.constant 0 : index
    %3 = vector.load %arg2[%c0_2, %c0_3, %c0_4] : memref<2x32x128xbf16, #tpu.memory_space<vmem>>, vector<1x32x128xbf16>
    %4 = vector.shape_cast %3 : vector<1x32x128xbf16> to vector<32x128xbf16>
    %cst = arith.constant dense<0.000000e+00> : vector<64x128xf32>
    %5 = tpu.matmul %2, %4, %cst {dimension_numbers = #tpu.dot_dimension_numbers<[1], [0], [0], [1], [0, 0, 1, 1], [], []>} : vector<64x32xbf16>, vector<32x128xbf16>, vector<64x128xf32> -> vector<64x128xf32>
    %6 = vector.extract_strided_slice %1 {offsets = [8, 0], sizes = [64, 32], strides = [1, 1]} : vector<72x32xbf16> to vector<64x32xbf16>
    %c1 = arith.constant 1 : index
    %c0_5 = arith.constant 0 : index
    %c0_6 = arith.constant 0 : index
    %7 = vector.load %arg2[%c1, %c0_5, %c0_6] : memref<2x32x128xbf16, #tpu.memory_space<vmem>>, vector<1x32x128xbf16>
    %8 = vector.shape_cast %7 : vector<1x32x128xbf16> to vector<32x128xbf16>
    %cst_7 = arith.constant dense<0.000000e+00> : vector<64x128xf32>
    %9 = tpu.matmul %6, %8, %cst_7 {dimension_numbers = #tpu.dot_dimension_numbers<[1], [0], [0], [1], [0, 0, 1, 1], [], []>} : vector<64x32xbf16>, vector<32x128xbf16>, vector<64x128xf32> -> vector<64x128xf32>
    %10 = arith.addf %5, %9 : vector<64x128xf32>
    %c0_8 = arith.constant 0 : index
    %c0_9 = arith.constant 0 : index
    %c0_10 = arith.constant 0 : index
    %11 = vector.load %arg3[%c0_8, %c0_9, %c0_10] : memref<1x64x128xf32, #tpu.memory_space<vmem>>, vector<1x64x128xf32>
    %12 = vector.shape_cast %11 : vector<1x64x128xf32> to vector<64x128xf32>
    %13 = vector.shape_cast %10 : vector<64x128xf32> to vector<1x64x128xf32>
    tpu.vector_store %arg3[%c0_8, %c0_9, %c0_10], %13 {strides = array<i32>} : memref<1x64x128xf32, #tpu.memory_space<vmem>>, vector<1x64x128xf32>,
    %cst_11 = arith.constant dense<0.000000e+00> : vector<128xf32>
    %14 = vector.multi_reduction <add>, %10, %cst_11 [0] : vector<64x128xf32> to vector<128xf32>
    %15 = vector.shape_cast %14 : vector<128xf32> to vector<1x128xf32>
    %c0_12 = arith.constant 0 : index
    %c0_13 = arith.constant 0 : index
    %c0_14 = arith.constant 0 : index
    %16 = vector.load %arg4[%c0_12, %c0_13, %c0_14] : memref<1x2x128xf32, #tpu.memory_space<vmem>>, vector<1x1x128xf32>
    %17 = vector.shape_cast %16 : vector<1x1x128xf32> to vector<1x128xf32>
    %18 = vector.shape_cast %15 : vector<1x128xf32> to vector<1x1x128xf32>
    tpu.vector_store %arg4[%c0_12, %c0_13, %c0_14], %18 {strides = array<i32>} : memref<1x2x128xf32, #tpu.memory_space<vmem>>, vector<1x1x128xf32>,
    %19 = arith.mulf %10, %10 : vector<64x128xf32>
    %cst_15 = arith.constant dense<0.000000e+00> : vector<128xf32>
    %20 = vector.multi_reduction <add>, %19, %cst_15 [0] : vector<64x128xf32> to vector<128xf32>
    %21 = vector.shape_cast %20 : vector<128xf32> to vector<1x128xf32>
    %c0_16 = arith.constant 0 : index
    %c1_17 = arith.constant 1 : index
    %c0_18 = arith.constant 0 : index
    %22 = vector.load %arg4[%c0_16, %c1_17, %c0_18] : memref<1x2x128xf32, #tpu.memory_space<vmem>>, vector<1x1x128xf32>
    %23 = vector.shape_cast %22 : vector<1x1x128xf32> to vector<1x128xf32>
    %24 = vector.shape_cast %21 : vector<1x128xf32> to vector<1x1x128xf32>
    tpu.vector_store %arg4[%c0_16, %c1_17, %c0_18], %24 {strides = array<i32>} : memref<1x2x128xf32, #tpu.memory_space<vmem>>, vector<1x1x128xf32>,
    return
  }
  func.func @transform_0(%arg0: i32) -> (i32, i32, i32) {
    %c0_i32 = arith.constant 0 : i32
    %c0_i32_0 = arith.constant 0 : i32
    %c0_i32_1 = arith.constant 0 : i32
    return %arg0, %c0_i32, %c0_i32_0 : i32, i32, i32
  }
  func.func @transform_1(%arg0: i32) -> (i32, i32, i32) {
    %c0_i32 = arith.constant 0 : i32
    %c0_i32_0 = arith.constant 0 : i32
    %c0_i32_1 = arith.constant 0 : i32
    %c0_i32_2 = arith.constant 0 : i32
    return %c0_i32, %c0_i32_0, %c0_i32_1 : i32, i32, i32
  }
  func.func @transform_2(%arg0: i32) -> (i32, i32, i32) {
    %c0_i32 = arith.constant 0 : i32
    %c0_i32_0 = arith.constant 0 : i32
    %c0_i32_1 = arith.constant 0 : i32
    return %arg0, %c0_i32, %c0_i32_0 : i32, i32, i32
  }
  func.func @transform_3(%arg0: i32) -> (i32, i32, i32) {
    %c0_i32 = arith.constant 0 : i32
    %c0_i32_0 = arith.constant 0 : i32
    %c0_i32_1 = arith.constant 0 : i32
    return %arg0, %c0_i32, %c0_i32_0 : i32, i32, i32
  }
}

module attributes {stable_mosaic.version = 11 : i64} {
  func.func @bn_lrelu_kernel(%arg0: i32, %arg1: memref<1x64x128xf32, #tpu.memory_space<vmem>>, %arg2: memref<1x128xf32, #tpu.memory_space<vmem>>, %arg3: memref<1x128xf32, #tpu.memory_space<vmem>>, %arg4: memref<1x64x128xf32, #tpu.memory_space<vmem>>) attributes {dimension_semantics = [#tpu.dimension_semantics<parallel>], iteration_bounds = array<i64: 2>, scalar_prefetch = 0 : i64, scratch_operands = 0 : i64, tpu.core_type = #tpu.core_type<tc>, window_params = [{transform_indices = @transform_0, window_bounds = array<i64: 1, 64, 128>}, {pipeline_mode = #tpu.pipeline_mode<synchronous>, transform_indices = @transform_1, window_bounds = array<i64: 1, 128>}, {pipeline_mode = #tpu.pipeline_mode<synchronous>, transform_indices = @transform_2, window_bounds = array<i64: 1, 128>}, {transform_indices = @transform_3, window_bounds = array<i64: 1, 64, 128>}]} {
    %c0 = arith.constant 0 : index
    %c0_0 = arith.constant 0 : index
    %c0_1 = arith.constant 0 : index
    %0 = vector.load %arg1[%c0, %c0_0, %c0_1] : memref<1x64x128xf32, #tpu.memory_space<vmem>>, vector<1x64x128xf32>
    %c0_2 = arith.constant 0 : index
    %c0_3 = arith.constant 0 : index
    %1 = vector.load %arg2[%c0_2, %c0_3] : memref<1x128xf32, #tpu.memory_space<vmem>>, vector<1x128xf32>
    %2 = vector.shape_cast %1 : vector<1x128xf32> to vector<1x1x128xf32>
    %3 = vector.broadcast %2 : vector<1x1x128xf32> to vector<1x64x128xf32>
    %4 = arith.mulf %0, %3 : vector<1x64x128xf32>
    %c0_4 = arith.constant 0 : index
    %c0_5 = arith.constant 0 : index
    %5 = vector.load %arg3[%c0_4, %c0_5] : memref<1x128xf32, #tpu.memory_space<vmem>>, vector<1x128xf32>
    %6 = vector.shape_cast %5 : vector<1x128xf32> to vector<1x1x128xf32>
    %7 = vector.broadcast %6 : vector<1x1x128xf32> to vector<1x64x128xf32>
    %8 = arith.addf %4, %7 : vector<1x64x128xf32>
    %cst = arith.constant 0.000000e+00 : f32
    %9 = vector.broadcast %cst : f32 to vector<1x64x128xf32>
    %10 = arith.cmpf oge, %8, %9 : vector<1x64x128xf32>
    %cst_6 = arith.constant 2.000000e-01 : f32
    %11 = vector.broadcast %cst_6 : f32 to vector<1x64x128xf32>
    %12 = arith.mulf %11, %8 : vector<1x64x128xf32>
    %13 = arith.select %10, %8, %12 : vector<1x64x128xi1>, vector<1x64x128xf32>
    %c0_7 = arith.constant 0 : index
    %c0_8 = arith.constant 0 : index
    %c0_9 = arith.constant 0 : index
    %14 = vector.load %arg4[%c0_7, %c0_8, %c0_9] : memref<1x64x128xf32, #tpu.memory_space<vmem>>, vector<1x64x128xf32>
    tpu.vector_store %arg4[%c0_7, %c0_8, %c0_9], %13 {strides = array<i32>} : memref<1x64x128xf32, #tpu.memory_space<vmem>>, vector<1x64x128xf32>,
    return
  }
  func.func @transform_0(%arg0: i32) -> (i32, i32, i32) {
    %c0_i32 = arith.constant 0 : i32
    %c0_i32_0 = arith.constant 0 : i32
    %c0_i32_1 = arith.constant 0 : i32
    return %arg0, %c0_i32, %c0_i32_0 : i32, i32, i32
  }
  func.func @transform_1(%arg0: i32) -> (i32, i32) {
    %c0_i32 = arith.constant 0 : i32
    %c0_i32_0 = arith.constant 0 : i32
    %c0_i32_1 = arith.constant 0 : i32
    return %c0_i32, %c0_i32_0 : i32, i32
  }
  func.func @transform_2(%arg0: i32) -> (i32, i32) {
    %c0_i32 = arith.constant 0 : i32
    %c0_i32_0 = arith.constant 0 : i32
    %c0_i32_1 = arith.constant 0 : i32
    return %c0_i32, %c0_i32_0 : i32, i32
  }
  func.func @transform_3(%arg0: i32) -> (i32, i32, i32) {
    %c0_i32 = arith.constant 0 : i32
    %c0_i32_0 = arith.constant 0 : i32
    %c0_i32_1 = arith.constant 0 : i32
    return %arg0, %c0_i32, %c0_i32_0 : i32, i32, i32
  }
}

</mosaic_0001>

<bundles_post_ra>
// kernel: d_block_forward.3
= control target key start
LH: loop header
LB: loop body
LE: loop exit
PB: predicated region body
PF: predicated region fallthrough
CT: control target
= control target key end

     0   :  { %s347_s12 = smov 0   ;;  %s380_s0 = inlined_call_operand.vmem [shape: f32[2,64,128], index: 0, kind: input, shape index: {}, may-alias: {0,3}]   ;;  %s381_s1 = inlined_call_operand.vmem [shape: f32[1,128], index: 1, kind: input, shape index: {}]   ;;  %s382_s2 = inlined_call_operand.vmem [shape: f32[1,128], index: 2, kind: input, shape index: {}]   ;;  %s383_s3 = inlined_call_operand.vmem [shape: f32[2,64,128], index: 3, kind: output, shape index: {}, may-alias: {0,3}]  }
   0x1 LB: > { %s296_s13 = sadd.s32 4294967295, %s325_s12   ;;  %p300_p0 = scmp.ge.s32.totalorder %s325_s12, 1  ;;  %s325_s12 = sphi %s347_s12, %s13_s12  }
   0x2   : > { %p137_p1 = scmp.lt.s32.totalorder %s325_s12, 3 }
   0x4   : > { %p138_p2 = pnand %p300_p0, %p137_p1 }
   0x5   : > { %p161_p3 = scmp.lt.s32.totalorder (!%p138_p2), %s296_s13, 1 }
   0x6   : > { %141 = sbr.rel (%p138_p2) target bundleno = 30 (0x1e), region = 32 }
   0xb   : > { %s385_s13 = smov (!%p161_p3, %s296_s13), 1  ;;  %v305_v0 = vld [vmem:[%s381_s1] ss:$0 sm:$0xff] }
   0xc   : > { %s309_s14 = sshll.u32 %s385_s13, 6  ;;  %v306_v1 = vld [vmem:[%s382_s2] ss:$0 sm:$0xff] }
   0xd   : > { %s165_s19 = scalar_lea.vmem %s380_s0, %s309_s14  ;;  %s367_s24 = scalar_lea.vmem %s383_s3, %s309_s14 }
   0xe   : > { %v171_v2 = vld [vmem:[%s165_s19] sm:$0xff]  ;;  %v172_v3 = vld [vmem:[%s165_s19 + $0x8] sm:$0xff]  ;;  %v173_v4 = vld [vmem:[%s165_s19 + $0x10] sm:$0xff] }
   0xf   : > { %v174_v5 = vld [vmem:[%s165_s19 + $0x18] sm:$0xff]  ;;  %v175_v6 = vld [vmem:[%s165_s19 + $0x20] sm:$0xff]  ;;  %v176_v7 = vld [vmem:[%s165_s19 + $0x28] sm:$0xff]  ;;  %v186_v8 = vmul.f32 %v305_v0, %v171_v2  ;;  %v187_v9 = vmul.f32 %v305_v0, %v172_v3  ;;  %v188_v10 = vmul.f32 %v305_v0, %v173_v4 }
  0x10   : > { %v177_v11 = vld [vmem:[%s165_s19 + $0x30] sm:$0xff]  ;;  %v178_v12 = vld [vmem:[%s165_s19 + $0x38] sm:$0xff]  ;;  %v189_v13 = vmul.f32 %v305_v0, %v174_v5  ;;  %v190_v14 = vmul.f32 %v305_v0, %v175_v6  ;;  %v191_v15 = vmul.f32 %v305_v0, %v176_v7 }
  0x11   : > { %v201_v16 = vadd.f32 %v306_v1, %v186_v8  ;;  %v202_v17 = vadd.f32 %v306_v1, %v187_v9  ;;  %v203_v18 = vadd.f32 %v306_v1, %v188_v10  ;;  %v192_v19 = vmul.f32 %v305_v0, %v177_v11 }
  0x12   : > { %v204_v20 = vadd.f32 %v306_v1, %v189_v13  ;;  %v205_v21 = vadd.f32 %v306_v1, %v190_v14  ;;  %v206_v22 = vadd.f32 %v306_v1, %v191_v15  ;;  %v193_v23 = vmul.f32 %v305_v0, %v178_v12 }
  0x13   : > { %vm209_vm0 = vcmp.ge.f32.partialorder %v201_v16, 0.0  ;;  %v217_v24 = vmul.f32 0.2, %v201_v16  ;;  %vm210_vm1 = vcmp.ge.f32.partialorder %v202_v17, 0.0  ;;  %v218_v25 = vmul.f32 0.2, %v202_v17 }
  0x14   : > { %vm211_vm2 = vcmp.ge.f32.partialorder %v203_v18, 0.0  ;;  %v219_v26 = vmul.f32 0.2, %v203_v18  ;;  %vm212_vm3 = vcmp.ge.f32.partialorder %v204_v20, 0.0  ;;  %v220_v27 = vmul.f32 0.2, %v204_v20 }
  0x15   : > { %v225_v28 = vsel %vm209_vm0, %v201_v16, %v217_v24  ;;  %v226_v29 = vsel %vm210_vm1, %v202_v17, %v218_v25  ;;  %vm213_vm4 = vcmp.ge.f32.partialorder %v205_v21, 0.0  ;;  %v221_v30 = vmul.f32 0.2, %v205_v21 }
  0x16   : > { %233 = vst [vmem:[%s367_s24] sm:$0xff] %v225_v28  ;;  %234 = vst [vmem:[%s367_s24 + $0x8] sm:$0xff] %v226_v29  ;;  %v227_v31 = vsel %vm211_vm2, %v203_v18, %v219_v26  ;;  %v228_v32 = vsel %vm212_vm3, %v204_v20, %v220_v27  ;;  %vm214_vm5 = vcmp.ge.f32.partialorder %v206_v22, 0.0  ;;  %v222_v33 = vmul.f32 0.2, %v206_v22 }
  0x17   : > { %235 = vst [vmem:[%s367_s24 + $0x10] sm:$0xff] %v227_v31  ;;  %236 = vst [vmem:[%s367_s24 + $0x18] sm:$0xff] %v228_v32  ;;  %v229_v34 = vsel %vm213_vm4, %v205_v21, %v221_v30  ;;  %v207_v35 = vadd.f32 %v306_v1, %v192_v19  ;;  %v208_v36 = vadd.f32 %v306_v1, %v193_v23 }
  0x18   : > { %237 = vst [vmem:[%s367_s24 + $0x20] sm:$0xff] %v229_v34  ;;  %v230_v37 = vsel %vm214_vm5, %v206_v22, %v222_v33 }
  0x19   : > { %238 = vst [vmem:[%s367_s24 + $0x28] sm:$0xff] %v230_v37  ;;  %vm215_vm6 = vcmp.ge.f32.partialorder %v207_v35, 0.0  ;;  %v223_v38 = vmul.f32 0.2, %v207_v35  ;;  %vm216_vm7 = vcmp.ge.f32.partialorder %v208_v36, 0.0 }
  0x1a   : > { %v224_v39 = vmul.f32 0.2, %v208_v36 }
  0x1b   : > { %v231_v40 = vsel %vm215_vm6, %v207_v35, %v223_v38 }
  0x1c   : > { %v232_v41 = vsel %vm216_vm7, %v208_v36, %v224_v39  ;;  %239 = vst [vmem:[%s367_s24 + $0x30] sm:$0xff] %v231_v40 }
  0x1d   : > { %240 = vst [vmem:[%s367_s24 + $0x38] sm:$0xff] %v232_v41 }
  0x1e PF: > { %s13_s12 = sadd.s32 1, %s325_s12  }
  0x1f   : > { %p10_p4 = scmp.ge.s32.totalorder %s13_s12, 4  }
  0x21   :  { %12 = sbr.rel (!%p10_p4) target bundleno = 1 (0x1), region = 62 }

// kernel: d_block_forward.2
= control target key start
LH: loop header
LB: loop body
LE: loop exit
PB: predicated region body
PF: predicated region fallthrough
CT: control target
= control target key end

     0   :  { %s657_s12 = smov 0   ;;  %s712_s0 = inlined_call_operand.vmem [shape: bf16[2,72,32], index: 0, kind: input, shape index: {}]   ;;  %s713_s1 = inlined_call_operand.vmem [shape: bf16[2,32,128], index: 1, kind: input, shape index: {}]   ;;  %s714_s2 = inlined_call_operand.vmem [shape: f32[2,64,128], index: 2, kind: output, shape index: {0}]   ;;  %s715_s3 = inlined_call_operand.vmem [shape: f32[2,2,128], index: 3, kind: output, shape index: {1}]  }
   0x1 LB: > { %s536_s13 = sadd.s32 4294967295, %s635_s12   ;;  %p540_p0 = scmp.ge.s32.totalorder %s635_s12, 1  ;;  %s635_s12 = sphi %s657_s12, %s14_s12  }
   0x2   : > { %p140_p1 = scmp.lt.s32.totalorder %s635_s12, 3 }
   0x4   : > { %p141_p2 = pnand %p540_p0, %p140_p1 }
   0x5   : > { %p168_p3 = scmp.lt.s32.totalorder (!%p141_p2), %s536_s13, 1 }
   0x6   : > { %144 = sbr.rel (%p141_p2) target bundleno = 250 (0xfa), region = 28 }
   0xb   : > { %v617_v0 = vld [vmem:[%s713_s1 + $0x18] sm:$0xff]   ;;  %v618_v1 = vld [vmem:[%s713_s1 + $0x8] sm:$0xff]   ;;  %v619_v2 = vld [vmem:[%s713_s1 + $0x10] sm:$0xff]   ;;  %s717_s13 = smov (!%p168_p3, %s536_s13), 1  ;;  %vm233_vm0 = vcmask 261120  }
   0xc   : > { %584 = vmatprep.subr.bf16.mxu0 %v617_v0  ;;  %596 = vmatprep.subr.bf16.mxu1 %v618_v1  ;;  %v620_v3 = vld [vmem:[%s713_s1] sm:$0xff]   ;;  %s608_s22 = smul.u32 36, %s717_s13  ;;  %s571_s26 = sshll.u32 %s717_s13, 6 }
   0xd   : > { %585 = vmatpush3.bf16.msra.mxu0 %v617_v0  ;;  %597 = vmatpush3.bf16.msra.mxu1 %v618_v1  ;;  %s695_s29 = scalar_lea.vmem %s714_s2, %s571_s26  ;;  %s544_s30 = sshll.u32 %s717_s13, 1 }
   0xe   : > { %586 = vmatprep.subr.bf16.mxu0 %v619_v2  ;;  %598 = vmatprep.subr.bf16.mxu1 %v620_v3  ;;  %s172_s25 = scalar_lea.vmem %s712_s0, %s608_s22  ;;  %s181_s6 = scalar_lea.vmem %s715_s3, %s544_s30 }
   0xf   : > { %v184_v4 = vld [vmem:[%s172_s25 + $0x4] sm:$0xf]  ;;  %v185_v5 = vld [vmem:[%s172_s25 + $0x8] sm:$0xf]  ;;  %v186_v6 = vld [vmem:[%s172_s25 + $0xc] sm:$0xf] }
  0x10   : > { %v187_v7 = vld [vmem:[%s172_s25 + $0x10] sm:$0xf]  ;;  %v549_v8 = vcombine.low %v184_v4, %v185_v5  ;;  %v560_v9 = vcombine.low %v185_v5, %v186_v6  ;;  %v183_v10 = vld [vmem:[%s172_s25] sm:$0xf]  ;;  %v188_v11 = vld [vmem:[%s172_s25 + $0x14] sm:$0xf] }
  0x11   : > { %587 = vmatpush3.bf16.msra.mxu0 %v619_v2  ;;  %599 = vmatpush3.bf16.msra.mxu1 %v620_v3  ;;  %v550_v12 = vcombine.low %v186_v6, %v187_v7  ;;  %v559_v13 = vcombine.low %v183_v10, %v184_v4  ;;  %v189_v14 = vld [vmem:[%s172_s25 + $0x18] sm:$0xf]  ;;  %v561_v15 = vcombine.low %v187_v7, %v188_v11  ;;  %v190_v17 = vld [vmem:[%s172_s25 + $0x1c] sm:$0xf]  ;;  %v191_v18 = vld [vmem:[%s172_s25 + $0x20] sm:$0xf] }
  0x12   : > { %588 = vmatprep.mubr.msk.bf16.mxu0 %vm233_vm0, %v549_v8  ;;  %v551_v16 = vcombine.low %v188_v11, %v189_v14  ;;  %v552_v19 = vcombine.low %v190_v17, %v191_v18  ;;  %v562_v20 = vcombine.low %v189_v14, %v190_v17 }
  0x13   : > { %600 = vmatprep.mubr.msk.bf16.mxu1 %vm233_vm0, %v559_v13 }
  0x14   : > { %589 = vmatmul.mubr.msk.bf16.vlgmr.msra.gmra.mxu0 %vm233_vm0, %v550_v12  ;;  %601 = vmatmul.mubr.msk.bf16.vlgmr.msra.gmra.mxu1 %vm233_vm0, %v560_v9 }
  0x15   : > { %592 = vmatprep.mubr.msk.bf16.mxu0 %vm233_vm0, %v551_v16  ;;  %604 = vmatprep.mubr.msk.bf16.mxu1 %vm233_vm0, %v561_v15 }
  0x1c   : > { %593 = vmatmul.mubr.msk.bf16.gmra.mxu0 %vm233_vm0, %v552_v19  ;;  %605 = vmatmul.mubr.msk.bf16.gmra.mxu1 %vm233_vm0, %v562_v20 }
  0xd4   : > { %v590_v21 = vpop.f32.mrf.mxu0  ;;  %v602_v22 = vpop.f32.mrf.mxu1 }
  0xd5   : > { %v384_v23 = vadd.f32 %v602_v22, %v590_v21 }
  0xd6   : > { %v280_v24 = vpop.f32.mrf.mxu0  ;;  %v375_v25 = vpop.f32.mrf.mxu1 }
  0xd7   : > { %408 = vst [vmem:[%s695_s29 + $0x10] sm:$0xff] %v384_v23  ;;  %v376_v26 = vadd.f32 %v375_v25, %v280_v24  ;;  %v430_v41 = vmul.f32 %v384_v23, %v384_v23 }
  0xd8   : > { %v591_v27 = vpop.f32.mrf.mxu0  ;;  %v603_v28 = vpop.f32.mrf.mxu1 }
  0xd9   : > { %406 = vst [vmem:[%s695_s29] sm:$0xff] %v376_v26  ;;  %v387_v29 = vadd.f32 %v603_v28, %v591_v27  ;;  %v428_v35 = vmul.f32 %v376_v26, %v376_v26 }
  0xda   : > { %v283_v30 = vpop.f32.mrf.mxu0  ;;  %v378_v31 = vpop.f32.mrf.mxu1 }
  0xdb   : > { %409 = vst [vmem:[%s695_s29 + $0x18] sm:$0xff] %v387_v29  ;;  %v379_v32 = vadd.f32 %v378_v31, %v283_v30  ;;  %v431_v47 = vmul.f32 %v387_v29, %v387_v29 }
  0xdc   : > { %v594_v33 = vpop.f32.mrf.mxu0  ;;  %v606_v34 = vpop.f32.mrf.mxu1 }
  0xdd   : > { %407 = vst [vmem:[%s695_s29 + $0x8] sm:$0xff] %v379_v32  ;;  %v414_v36 = vadd.f32 %v379_v32, %v376_v26  ;;  %v429_v37 = vmul.f32 %v379_v32, %v379_v32  ;;  %v400_v38 = vadd.f32 %v606_v34, %v594_v33 }
  0xde   : > { %v296_v39 = vpop.f32.mrf.mxu0  ;;  %v391_v40 = vpop.f32.mrf.mxu1 }
  0xdf   : > { %v415_v42 = vadd.f32 %v414_v36, %v384_v23  ;;  %v436_v43 = vadd.f32 %v429_v37, %v428_v35  ;;  %412 = vst [vmem:[%s695_s29 + $0x30] sm:$0xff] %v400_v38  ;;  %v392_v44 = vadd.f32 %v391_v40, %v296_v39  ;;  %v434_v60 = vmul.f32 %v400_v38, %v400_v38 }
  0xe0   : > { %v595_v45 = vpop.f32.mrf.mxu0  ;;  %v607_v46 = vpop.f32.mrf.mxu1 }
  0xe1   : > { %v437_v48 = vadd.f32 %v436_v43, %v430_v41  ;;  %410 = vst [vmem:[%s695_s29 + $0x20] sm:$0xff] %v392_v44  ;;  %v416_v49 = vadd.f32 %v415_v42, %v387_v29  ;;  %v403_v50 = vadd.f32 %v607_v46, %v595_v45  ;;  %v432_v54 = vmul.f32 %v392_v44, %v392_v44 }
  0xe2   : > { %v299_v51 = vpop.f32.mrf.mxu0  ;;  %v394_v52 = vpop.f32.mrf.mxu1 }
  0xe3   : > { %v417_v53 = vadd.f32 %v416_v49, %v392_v44  ;;  %v438_v55 = vadd.f32 %v437_v48, %v431_v47  ;;  %413 = vst [vmem:[%s695_s29 + $0x38] sm:$0xff] %v403_v50  ;;  %v395_v56 = vadd.f32 %v394_v52, %v299_v51  ;;  %v435_v63 = vmul.f32 %v403_v50, %v403_v50 }
  0xe5   : > { %v439_v57 = vadd.f32 %v438_v55, %v432_v54  ;;  %411 = vst [vmem:[%s695_s29 + $0x28] sm:$0xff] %v395_v56  ;;  %v418_v58 = vadd.f32 %v417_v53, %v395_v56  ;;  %v433_v59 = vmul.f32 %v395_v56, %v395_v56 }
  0xe7   : > { %v419_v61 = vadd.f32 %v418_v58, %v400_v38  ;;  %v440_v62 = vadd.f32 %v439_v57, %v433_v59 }
  0xe9   : > { %v420_v0 = vadd.f32 %v419_v61, %v403_v50  ;;  %v441_v1 = vadd.f32 %v440_v62, %v434_v60 }
  0xeb   : > { %v421_v2 = vrot.slane %v420_v0, 4  ;;  %v442_v3 = vadd.f32 %v441_v1, %v435_v63 }
  0xed   : > { %v422_v4 = vadd.f32 %v421_v2, %v420_v0  ;;  %v443_v5 = vrot.slane %v442_v3, 4 }
  0xef   : > { %v423_v6 = vrot.slane %v422_v4, 2  ;;  %v444_v7 = vadd.f32 %v443_v5, %v442_v3 }
  0xf1   : > { %v424_v8 = vadd.f32 %v423_v6, %v422_v4  ;;  %v445_v9 = vrot.slane %v444_v7, 2 }
  0xf3   : > { %v425_v10 = vrot.slane %v424_v8, 1  ;;  %v446_v11 = vadd.f32 %v445_v9, %v444_v7 }
  0xf5   : > { %v426_v12 = vadd.f32 %v425_v10, %v424_v8  ;;  %v447_v13 = vrot.slane %v446_v11, 1 }
  0xf7   : > { %427 = vst [vmem:[%s181_s6] sm:$0x1] %v426_v12  ;;  %v448_v14 = vadd.f32 %v447_v13, %v446_v11 }
  0xf9   : > { %449 = vst [vmem:[%s181_s6 + $0x1] sm:$0x1] %v448_v14 }
  0xfa PF: > { %s14_s12 = sadd.s32 1, %s635_s12  }
  0xfb   : > { %p11_p4 = scmp.ge.s32.totalorder %s14_s12, 4  }
  0xfd   :  { %13 = sbr.rel (!%p11_p4) target bundleno = 1 (0x1), region = 71 }

</bundles_post_ra>
